<compile_context>
chip_gen: v7x
topology: tpu7x:2x2x1
jax: 0.10.0
libtpu: 0.0.40
codegen_flags: <defaults>
</compile_context>

<pallas_src>
import jax
import jax.numpy as jnp
from jax import lax
from jax.experimental import pallas as pl
from jax.experimental.pallas import tpu as pltpu


def _psd_tile_kernel(a_ref, b_ref, o_ref, acc_ref):
    # a_ref: (tm, tk) rows-block of M at (i, k)
    # b_ref: (tn, tk) rows-block of M at (j, k)  -> acts as M^T via NT contraction
    # o_ref: (tm, tn) output tile at (i, j)
    # acc_ref: (tm, tn) f32 accumulator, resident across the K axis
    @pl.when(pl.program_id(2) == 0)
    def _():
        acc_ref[...] = jnp.zeros_like(acc_ref)

    acc_ref[...] += lax.dot_general(
        a_ref[...],
        b_ref[...],
        dimension_numbers=(((1,), (1,)), ((), ())),  # contract last dim of both (NT matmul)
        preferred_element_type=jnp.float32,
    )

    @pl.when(pl.program_id(2) == pl.num_programs(2) - 1)
    def _():
        o_ref[...] = acc_ref[...].astype(o_ref.dtype)


def _psd_single_kernel(a_ref, o_ref):
    # Whole matrix resident in VMEM: one MXU call, no grid overhead.
    a = a_ref[...]
    o_ref[...] = lax.dot_general(
        a,
        a,
        dimension_numbers=(((1,), (1,)), ((), ())),
        preferred_element_type=jnp.float32,
    ).astype(o_ref.dtype)


def psd_symmetric_matrix(m, *, tm=128, tn=128):
    """Compute m @ m.T for a square matrix m with a Pallas TPU kernel."""
    N = m.shape[0]
    assert m.shape == (N, N), "PSDSymmetricMatrix parameter must be square"

    # Small / non-tileable parameter: single invocation, everything in VMEM.
    if N % 128 != 0 or N <= 256:
        return pl.pallas_call(
            _psd_single_kernel,
            out_shape=jax.ShapeDtypeStruct((N, N), m.dtype),
        )(m)

    # Tiled MXU path for larger parameters.
    tk = 256 if N % 256 == 0 else 128
    grid = (N // tm, N // tn, N // tk)

    return pl.pallas_call(
        _psd_tile_kernel,
        out_shape=jax.ShapeDtypeStruct((N, N), m.dtype),
        grid_spec=pltpu.PrefetchScalarGridSpec(
            num_scalar_prefetch=0,
            grid=grid,
            in_specs=[
                pl.BlockSpec((tm, tk), lambda i, j, k: (i, k)),  # rows i of M
                pl.BlockSpec((tn, tk), lambda i, j, k: (j, k)),  # rows j of M (NT contraction)
            ],
            out_specs=pl.BlockSpec((tm, tn), lambda i, j, k: (i, j)),
            scratch_shapes=[pltpu.VMEM((tm, tn), jnp.float32)],
        ),
        compiler_params=pltpu.CompilerParams(
            dimension_semantics=("parallel", "parallel", "arbitrary"),
        ),
    )(m, m)


if __name__ == "__main__":
    key = jax.random.PRNGKey(0)
    k1, k2 = jax.random.split(key)

    # Small trainable parameter matrix (exercises the single-block path),
    # mimicking nn.Parameter(torch.randn(N, N)).
    n_small = 256
    m_small = jax.random.normal(k1, (n_small, n_small), jnp.float32)
    out_small = jax.block_until_ready(psd_symmetric_matrix(m_small))
    ref_small = jnp.einsum("ik,jk->ij", m_small, m_small,
                           precision=lax.Precision.HIGHEST)
    assert out_small.shape == (n_small, n_small)
    assert jnp.allclose(out_small, ref_small, atol=2e-2, rtol=2e-2)
    # Result must be symmetric by construction.
    assert jnp.allclose(out_small, out_small.T, atol=2e-2, rtol=2e-2)

    # Larger parameter matrix (exercises the tiled MXU path with K accumulation).
    n_big = 512
    m_big = jax.random.normal(k2, (n_big, n_big), jnp.float32)
    out_big = jax.block_until_ready(psd_symmetric_matrix(m_big))
    ref_big = jnp.einsum("ik,jk->ij", m_big, m_big,
                         precision=lax.Precision.HIGHEST)
    assert out_big.shape == (n_big, n_big)
    assert jnp.allclose(out_big, ref_big, atol=2e-2, rtol=2e-2)
    assert jnp.allclose(out_big, out_big.T, atol=2e-2, rtol=2e-2)

    print("KERNEL_OK")
</pallas_src>

<mosaic_0001>
module attributes {stable_mosaic.version = 11 : i64} {
  func.func @_psd_single_kernel(%arg0: memref<256x256xf32, #tpu.memory_space<vmem>>, %arg1: memref<256x256xf32, #tpu.memory_space<vmem>>) attributes {dimension_semantics = [], scalar_prefetch = 0 : i64, scratch_operands = 0 : i64, tpu.core_type = #tpu.core_type<tc>} {
    %c0 = arith.constant 0 : index
    %c0_0 = arith.constant 0 : index
    %0 = vector.load %arg0[%c0, %c0_0] : memref<256x256xf32, #tpu.memory_space<vmem>>, vector<256x256xf32>
    %cst = arith.constant dense<0.000000e+00> : vector<256x256xf32>
    %1 = tpu.matmul %0, %0, %cst {dimension_numbers = #tpu.dot_dimension_numbers<[1], [1], [0], [0], [0, 0, 1, 0], [], []>} : vector<256x256xf32>, vector<256x256xf32>, vector<256x256xf32> -> vector<256x256xf32>
    %c0_1 = arith.constant 0 : index
    %c0_2 = arith.constant 0 : index
    %2 = vector.load %arg1[%c0_1, %c0_2] : memref<256x256xf32, #tpu.memory_space<vmem>>, vector<256x256xf32>
    tpu.vector_store %arg1[%c0_1, %c0_2], %1 {strides = array<i32>} : memref<256x256xf32, #tpu.memory_space<vmem>>, vector<256x256xf32>,
    return
  }
}

</mosaic_0001>

<bundles_post_ra>
// kernel: tpu_custom_call.1
= control target key start
LH: loop header
LB: loop body
LE: loop exit
PB: predicated region body
PF: predicated region fallthrough
CT: control target
= control target key end

     0   :  { %6 = vsyncpa [#allocation3], 0  ;;  %s861_s0 = inlined_call_operand.hbm [shape: f32[256,256], index: 0, kind: input, shape index: {}]   ;;  %s862_s1 = inlined_call_operand.hbm [shape: f32[256,256], index: 1, kind: output, shape index: {}]  }
   0x1   :  { %7 = vsyncpa [#allocation4], 0  ;;  %s573_s6 = smov [#allocation2]   ;;  %s525_s10 = scalar_lea.hbm %s861_s0, 8192 }
   0x2   :  { %s13_s7 = sshll.u32 %s573_s6, 4  ;;  %p526_p0 = scmp.ne.s32.totalorder %s861_s0, %s525_s10  ;;  %s14_s7 = int_to_ptr.vmem [resolvable:$true] %s13_s7 }
   0x3   :  { %p529_p1 = scmp.lt.u32.totalorder %s525_s10, %s861_s0 }
   0x5   :  { %p531_p2 = pnand %p529_p1, %p526_p0 }
   0x7   :  { %534 = shalt.err (!%p531_p2)
}
   0x8   :  { %s535_s15 = scalar_lea.vmem %s14_s7, 8192  ;;  %p540_p4 = scmp.lt.s32.totalorder %s14_s7, %s14_s7 }
   0x9   :  { %p536_p3 = scmp.ne.s32.totalorder %s14_s7, %s535_s15  ;;  %p541_p5 = scmp.lt.s32.totalorder %s535_s15, %s535_s15 }
   0xb   :  { %p542_p6 = por %p541_p5, %p540_p4 }
   0xd   :  { %p543_p7 = pnand %p542_p6, %p536_p3 }
   0xf   :  { %546 = shalt.err (!%p543_p7)
}
  0x10   :  { %s574_s16 = smov 256   ;;  %s575_s17 = smov 16  }
  0x11   :  { %19 = dma.hbm_to_vmem [thread:$0]  %s861_s0, 8192, %s14_s7, [#allocation3], %s574_s16, %s574_s16, %s575_s17  }
  0x12   :  { %569 = dma.done.wait [#allocation3], 8192  }
  0x13   :  { %570 = vsyncadd [#allocation3], 4294959104  ;;  %v24_v0 = vld [vmem:[#allocation2 + $0x8] sm:$0xff]  ;;  %v602_v1 = vld [vmem:[#allocation2 + $0x18] sm:$0xff]  ;;  %s576_s0 = smov [#allocation5]  }
  0x14   :  { %v604_v2 = vld [vmem:[#allocation2] sm:$0xff]  ;;  %v425_v3 = vpack.c.bf16 %v602_v1, %v24_v0  ;;  %v607_v4 = vld [vmem:[#allocation2 + $0x10] sm:$0xff]  ;;  %v609_v5 = vld [vmem:[#allocation2 + $0x28] sm:$0xff]  ;;  %151 = vmatprep.mubr.f32.mxu0 %v24_v0  ;;  %s413_s20 = sshll.u32 %s576_s0, 4  ;;  %s414_s20 = int_to_ptr.vmem [resolvable:$true] %s413_s20 }
  0x15   :  { %v611_v6 = vld [vmem:[#allocation2 + $0x38] sm:$0xff]  ;;  %v427_v7 = vpack.c.bf16 %v607_v4, %v604_v2  ;;  %v617_v9 = vld [vmem:[#allocation2 + $0x20] sm:$0xff]  ;;  %v619_v10 = vld [vmem:[#allocation2 + $0x30] sm:$0xff]  ;;  %s547_s21 = scalar_lea.vmem %s414_s20, 8192  ;;  %p552_p9 = scmp.lt.s32.totalorder %s414_s20, %s414_s20 }
  0x16   :  { %v429_v8 = vpack.c.bf16 %v611_v6, %v609_v5  ;;  %426 = vmatprep.subr.bf16.mxu0 %v425_v3  ;;  %489 = vmatprep.subr.bf16.mxu1 %v425_v3  ;;  %v621_v11 = vld [vmem:[#allocation2 + $0x48] sm:$0xff]  ;;  %v623_v12 = vld [vmem:[#allocation2 + $0x58] sm:$0xff]  ;;  %v431_v13 = vpack.c.bf16 %v619_v10, %v617_v9  ;;  %v629_v16 = vld [vmem:[#allocation2 + $0x40] sm:$0xff]  ;;  %p548_p8 = scmp.ne.s32.totalorder %s414_s20, %s547_s21  ;;  %p553_p10 = scmp.lt.s32.totalorder %s547_s21, %s547_s21 }
  0x17   :  { %428 = vmatpush1.bf16.xpose.msra.mxu0 %v427_v7  ;;  %505 = vmatpush1.bf16.xpose.msra.mxu1 %v427_v7  ;;  %v433_v14 = vpack.c.bf16 %v623_v12, %v621_v11  ;;  %v56_v15 = vld [vmem:[#allocation2 + $0x108] sm:$0xff]  ;;  %v631_v17 = vld [vmem:[#allocation2 + $0x50] sm:$0xff]  ;;  %v635_v19 = vld [vmem:[#allocation2 + $0x78] sm:$0xff] }
  0x18   :  { %430 = vmatprep.subr.bf16.mxu0 %v429_v8  ;;  %490 = vmatprep.subr.bf16.mxu1 %v429_v8  ;;  %v633_v18 = vld [vmem:[#allocation2 + $0x68] sm:$0xff]  ;;  %v435_v20 = vpack.c.bf16 %v631_v17, %v629_v16  ;;  %v641_v22 = vld [vmem:[#allocation2 + $0x60] sm:$0xff]  ;;  %v643_v23 = vld [vmem:[#allocation2 + $0x70] sm:$0xff]  ;;  %p554_p11 = por %p553_p10, %p552_p9 }
  0x19   :  { %247 = vmatprep.mubr.f32.mxu1 %v56_v15  ;;  %v437_v21 = vpack.c.bf16 %v635_v19, %v633_v18  ;;  %v645_v24 = vld [vmem:[#allocation2 + $0x88] sm:$0xff]  ;;  %v647_v25 = vld [vmem:[#allocation2 + $0x98] sm:$0xff]  ;;  %v439_v26 = vpack.c.bf16 %v643_v23, %v641_v22  ;;  %v653_v28 = vld [vmem:[#allocation2 + $0x80] sm:$0xff] }
  0x1a   :  { %v441_v27 = vpack.c.bf16 %v647_v25, %v645_v24  ;;  %v655_v29 = vld [vmem:[#allocation2 + $0x90] sm:$0xff]  ;;  %v657_v30 = vld [vmem:[#allocation2 + $0xa8] sm:$0xff]  ;;  %v659_v31 = vld [vmem:[#allocation2 + $0xb8] sm:$0xff]  ;;  %p555_p12 = pnand %p554_p11, %p548_p8 }
  0x1b   :  { %v443_v32 = vpack.c.bf16 %v655_v29, %v653_v28  ;;  %v445_v33 = vpack.c.bf16 %v659_v31, %v657_v30  ;;  %v665_v34 = vld [vmem:[#allocation2 + $0xa0] sm:$0xff]  ;;  %v667_v35 = vld [vmem:[#allocation2 + $0xb0] sm:$0xff]  ;;  %v669_v36 = vld [vmem:[#allocation2 + $0xc8] sm:$0xff] }
  0x1c   :  { %v671_v37 = vld [vmem:[#allocation2 + $0xd8] sm:$0xff]  ;;  %v447_v38 = vpack.c.bf16 %v667_v35, %v665_v34  ;;  %v677_v40 = vld [vmem:[#allocation2 + $0xc0] sm:$0xff]  ;;  %v679_v41 = vld [vmem:[#allocation2 + $0xd0] sm:$0xff] }
  0x1d   :  { %v449_v39 = vpack.c.bf16 %v671_v37, %v669_v36  ;;  %v681_v42 = vld [vmem:[#allocation2 + $0xe8] sm:$0xff]  ;;  %v683_v43 = vld [vmem:[#allocation2 + $0xf8] sm:$0xff]  ;;  %v451_v44 = vpack.c.bf16 %v679_v41, %v677_v40  ;;  %v689_v46 = vld [vmem:[#allocation2 + $0xe0] sm:$0xff] }
  0x1e   :  { %v453_v45 = vpack.c.bf16 %v683_v43, %v681_v42  ;;  %v691_v47 = vld [vmem:[#allocation2 + $0xf0] sm:$0xff]  ;;  %v693_v48 = vld [vmem:[#allocation2 + $0x118] sm:$0xff]  ;;  %v698_v51 = vld [vmem:[#allocation2 + $0x100] sm:$0xff] }
  0x1f   :  { %432 = vmatpush1.bf16.xpose.msra.mxu0 %v431_v13  ;;  %506 = vmatpush1.bf16.xpose.msra.mxu1 %v431_v13  ;;  %864 = vst [vmem:[#allocation8_spill] sm:$0xff] %v691_v47  ;;  %v455_v49 = vpack.c.bf16 %v691_v47, %v689_v46  ;;  %v457_v50 = vpack.c.bf16 %v693_v48, %v56_v15  ;;  %v700_v52 = vld [vmem:[#allocation2 + $0x110] sm:$0xff]  ;;  %v702_v53 = vld [vmem:[#allocation2 + $0x128] sm:$0xff]  ;;  %v704_v54 = vld [vmem:[#allocation2 + $0x138] sm:$0xff] }
  0x20   :  { %434 = vmatprep.subr.bf16.mxu0 %v433_v14  ;;  %491 = vmatprep.subr.bf16.mxu1 %v433_v14  ;;  %v459_v55 = vpack.c.bf16 %v700_v52, %v698_v51  ;;  %v461_v56 = vpack.c.bf16 %v704_v54, %v702_v53  ;;  %v710_v57 = vld [vmem:[#allocation2 + $0x120] sm:$0xff]  ;;  %v712_v58 = vld [vmem:[#allocation2 + $0x130] sm:$0xff]  ;;  %v714_v59 = vld [vmem:[#allocation2 + $0x148] sm:$0xff] }
  0x21   :  { %v716_v60 = vld [vmem:[#allocation2 + $0x158] sm:$0xff]  ;;  %v463_v61 = vpack.c.bf16 %v712_v58, %v710_v57  ;;  %v722_v63 = vld [vmem:[#allocation2 + $0x140] sm:$0xff]  ;;  %v724_v0 = vld [vmem:[#allocation2 + $0x150] sm:$0xff] }
  0x22   :  { %v465_v62 = vpack.c.bf16 %v716_v60, %v714_v59  ;;  %v726_v3 = vld [vmem:[#allocation2 + $0x168] sm:$0xff]  ;;  %v728_v7 = vld [vmem:[#allocation2 + $0x178] sm:$0xff]  ;;  %v467_v8 = vpack.c.bf16 %v724_v0, %v722_v63  ;;  %v734_v14 = vld [vmem:[#allocation2 + $0x160] sm:$0xff] }
  0x23   :  { %v469_v13 = vpack.c.bf16 %v728_v7, %v726_v3  ;;  %v736_v15 = vld [vmem:[#allocation2 + $0x170] sm:$0xff] }
  0x27   :  { %436 = vmatpush1.bf16.xpose.msra.mxu0 %v435_v20  ;;  %507 = vmatpush1.bf16.xpose.msra.mxu1 %v435_v20  ;;  %v738_v20 = vld [vmem:[#allocation2 + $0x188] sm:$0xff] }
  0x28   :  { %438 = vmatprep.subr.bf16.mxu0 %v437_v21  ;;  %492 = vmatprep.subr.bf16.mxu1 %v437_v21  ;;  %v740_v21 = vld [vmem:[#allocation2 + $0x198] sm:$0xff] }
  0x2f   :  { %440 = vmatpush1.bf16.xpose.msra.mxu0 %v439_v26  ;;  %508 = vmatpush1.bf16.xpose.msra.mxu1 %v439_v26  ;;  %v471_v26 = vpack.c.bf16 %v736_v15, %v734_v14 }
  0x30   :  { %442 = vmatprep.subr.bf16.mxu0 %v441_v27  ;;  %493 = vmatprep.subr.bf16.mxu1 %v441_v27  ;;  %v473_v27 = vpack.c.bf16 %v740_v21, %v738_v20 }
  0x37   :  { %444 = vmatpush1.bf16.xpose.msra.mxu0 %v443_v32  ;;  %509 = vmatpush1.bf16.xpose.msra.mxu1 %v443_v32  ;;  %v746_v32 = vld [vmem:[#allocation2 + $0x180] sm:$0xff] }
  0x38   :  { %446 = vmatprep.subr.bf16.mxu0 %v445_v33  ;;  %494 = vmatprep.subr.bf16.mxu1 %v445_v33  ;;  %v748_v33 = vld [vmem:[#allocation2 + $0x190] sm:$0xff] }
  0x3f   :  { %448 = vmatpush1.bf16.xpose.msra.mxu0 %v447_v38  ;;  %510 = vmatpush1.bf16.xpose.msra.mxu1 %v447_v38  ;;  %v750_v38 = vld [vmem:[#allocation2 + $0x1a8] sm:$0xff] }
  0x40   :  { %450 = vmatprep.subr.bf16.mxu0 %v449_v39  ;;  %495 = vmatprep.subr.bf16.mxu1 %v449_v39  ;;  %v752_v39 = vld [vmem:[#allocation2 + $0x1b8] sm:$0xff] }
  0x47   :  { %452 = vmatpush1.bf16.xpose.msra.mxu0 %v451_v44  ;;  %511 = vmatpush1.bf16.xpose.msra.mxu1 %v451_v44  ;;  %v475_v44 = vpack.c.bf16 %v748_v33, %v746_v32 }
  0x48   :  { %454 = vmatprep.subr.bf16.mxu0 %v453_v45  ;;  %496 = vmatprep.subr.bf16.mxu1 %v453_v45  ;;  %v477_v45 = vpack.c.bf16 %v752_v39, %v750_v38 }
  0x4f   :  { %456 = vmatpush1.bf16.xpose.msra.mxu0 %v455_v49  ;;  %512 = vmatpush1.bf16.xpose.msra.mxu1 %v455_v49  ;;  %v758_v49 = vld [vmem:[#allocation2 + $0x1a0] sm:$0xff] }
  0x50   :  { %458 = vmatprep.subr.bf16.mxu0 %v457_v50  ;;  %497 = vmatprep.subr.bf16.mxu1 %v457_v50  ;;  %v760_v50 = vld [vmem:[#allocation2 + $0x1b0] sm:$0xff] }
  0x57   :  { %460 = vmatpush1.bf16.xpose.msra.mxu0 %v459_v55  ;;  %513 = vmatpush1.bf16.xpose.msra.mxu1 %v459_v55  ;;  %v762_v55 = vld [vmem:[#allocation2 + $0x1c8] sm:$0xff] }
  0x58   :  { %462 = vmatprep.subr.bf16.mxu0 %v461_v56  ;;  %498 = vmatprep.subr.bf16.mxu1 %v461_v56  ;;  %v764_v56 = vld [vmem:[#allocation2 + $0x1d8] sm:$0xff] }
  0x5f   :  { %464 = vmatpush1.bf16.xpose.msra.mxu0 %v463_v61  ;;  %514 = vmatpush1.bf16.xpose.msra.mxu1 %v463_v61  ;;  %v479_v61 = vpack.c.bf16 %v760_v50, %v758_v49 }
  0x60   :  { %466 = vmatprep.subr.bf16.mxu0 %v465_v62  ;;  %499 = vmatprep.subr.bf16.mxu1 %v465_v62  ;;  %v481_v62 = vpack.c.bf16 %v764_v56, %v762_v55 }
  0x67   :  { %468 = vmatpush1.bf16.xpose.msra.mxu0 %v467_v8  ;;  %515 = vmatpush1.bf16.xpose.msra.mxu1 %v467_v8  ;;  %v770_v8 = vld [vmem:[#allocation2 + $0x1c0] sm:$0xff] }
  0x68   :  { %470 = vmatprep.subr.bf16.mxu0 %v469_v13  ;;  %500 = vmatprep.subr.bf16.mxu1 %v469_v13  ;;  %v772_v13 = vld [vmem:[#allocation2 + $0x1d0] sm:$0xff] }
  0x6f   :  { %472 = vmatpush1.bf16.xpose.msra.mxu0 %v471_v26  ;;  %516 = vmatpush1.bf16.xpose.msra.mxu1 %v471_v26  ;;  %v774_v26 = vld [vmem:[#allocation2 + $0x1e8] sm:$0xff] }
  0x70   :  { %474 = vmatprep.subr.bf16.mxu0 %v473_v27  ;;  %501 = vmatprep.subr.bf16.mxu1 %v473_v27  ;;  %v776_v27 = vld [vmem:[#allocation2 + $0x1f8] sm:$0xff] }
  0x77   :  { %476 = vmatpush1.bf16.xpose.msra.mxu0 %v475_v44  ;;  %517 = vmatpush1.bf16.xpose.msra.mxu1 %v475_v44  ;;  %v483_v44 = vpack.c.bf16 %v772_v13, %v770_v8 }
  0x78   :  { %478 = vmatprep.subr.bf16.mxu0 %v477_v45  ;;  %502 = vmatprep.subr.bf16.mxu1 %v477_v45  ;;  %v485_v45 = vpack.c.bf16 %v776_v27, %v774_v26 }
  0x7f   :  { %480 = vmatpush1.bf16.xpose.msra.mxu0 %v479_v61  ;;  %518 = vmatpush1.bf16.xpose.msra.mxu1 %v479_v61  ;;  %v83_v61 = vld [vmem:[#allocation2 + $0x1e0] sm:$0xff] }
  0x80   :  { %482 = vmatprep.subr.bf16.mxu0 %v481_v62  ;;  %503 = vmatprep.subr.bf16.mxu1 %v481_v62  ;;  %v782_v62 = vld [vmem:[#allocation2 + $0x1f0] sm:$0xff] }
  0x81   :  { %v487_v47 = vpack.c.bf16 %v782_v62, %v83_v61 }
  0x87   :  { %484 = vmatpush1.bf16.xpose.msra.mxu0 %v483_v44  ;;  %519 = vmatpush1.bf16.xpose.msra.mxu1 %v483_v44 }
  0x88   :  { %486 = vmatprep.subr.bf16.mxu0 %v485_v45  ;;  %504 = vmatprep.subr.bf16.mxu1 %v485_v45 }
  0x8f   :  { %488 = vmatpush1.bf16.xpose.msra.mxu0 %v487_v47  ;;  %520 = vmatpush1.bf16.xpose.msra.mxu1 %v487_v47 }
  0x96   :  { %152 = vmatmul.mubr.f32.vlgmr.msra.gmra.mrb[0].mxu0 %v604_v2  ;;  %248 = vmatmul.mubr.f32.vlgmr.msra.gmra.mrb[0].mxu1 %v698_v51 }
  0x97   :  { %157 = vmatprep.mubr.f32.mxu0 %v602_v1  ;;  %253 = vmatprep.mubr.f32.mxu1 %v693_v48  ;;  %v865_v1 = vld [vmem:[#allocation8_spill] sm:$0xff] }
  0x9a   :  { %158 = vmatmul.mubr.f32.gmra.mrb[2].mxu0 %v607_v4  ;;  %254 = vmatmul.mubr.f32.gmra.mrb[2].mxu1 %v700_v52 }
  0x9b   :  { %163 = vmatprep.mubr.f32.mxu0 %v609_v5  ;;  %259 = vmatprep.mubr.f32.mxu1 %v702_v53 }
  0x9e   :  { %164 = vmatmul.mubr.f32.gmra.mrb[4].mxu0 %v617_v9  ;;  %260 = vmatmul.mubr.f32.gmra.mrb[4].mxu1 %v710_v57 }
  0x9f   :  { %169 = vmatprep.mubr.f32.mxu0 %v611_v6  ;;  %265 = vmatprep.mubr.f32.mxu1 %v704_v54 }
  0xa2   :  { %170 = vmatmul.mubr.f32.gmra.mrb[6].mxu0 %v619_v10  ;;  %266 = vmatmul.mubr.f32.gmra.mrb[6].mxu1 %v712_v58 }
  0xa3   :  { %175 = vmatprep.mubr.f32.mxu0 %v621_v11  ;;  %271 = vmatprep.mubr.f32.mxu1 %v714_v59 }
  0xa6   :  { %176 = vmatmul.mubr.f32.gmra.mrb[8].mxu0 %v629_v16  ;;  %272 = vmatmul.mubr.f32.gmra.mrb[8].mxu1 %v722_v63 }
  0xa7   :  { %181 = vmatprep.mubr.f32.mxu0 %v623_v12  ;;  %277 = vmatprep.mubr.f32.mxu1 %v716_v60 }
  0xaa   :  { %182 = vmatmul.mubr.f32.gmra.mrb[10].mxu0 %v631_v17  ;;  %278 = vmatmul.mubr.f32.gmra.mrb[10].mxu1 %v724_v0 }
  0xab   :  { %187 = vmatprep.mubr.f32.mxu0 %v633_v18  ;;  %283 = vmatprep.mubr.f32.mxu1 %v726_v3 }
  0xae   :  { %188 = vmatmul.mubr.f32.gmra.mrb[12].mxu0 %v641_v22  ;;  %284 = vmatmul.mubr.f32.gmra.mrb[12].mxu1 %v734_v14 }
  0xaf   :  { %193 = vmatprep.mubr.f32.mxu0 %v635_v19  ;;  %289 = vmatprep.mubr.f32.mxu1 %v728_v7 }
  0xb2   :  { %194 = vmatmul.mubr.f32.gmra.mrb[14].mxu0 %v643_v23  ;;  %290 = vmatmul.mubr.f32.gmra.mrb[14].mxu1 %v736_v15 }
  0xb3   :  { %199 = vmatprep.mubr.f32.mxu0 %v645_v24  ;;  %295 = vmatprep.mubr.f32.mxu1 %v738_v20 }
  0xb6   :  { %200 = vmatmul.mubr.f32.gmra.mrb[16].mxu0 %v653_v28  ;;  %296 = vmatmul.mubr.f32.gmra.mrb[16].mxu1 %v746_v32 }
  0xb7   :  { %205 = vmatprep.mubr.f32.mxu0 %v647_v25  ;;  %301 = vmatprep.mubr.f32.mxu1 %v740_v21 }
  0xba   :  { %206 = vmatmul.mubr.f32.gmra.mrb[18].mxu0 %v655_v29  ;;  %302 = vmatmul.mubr.f32.gmra.mrb[18].mxu1 %v748_v33 }
  0xbb   :  { %211 = vmatprep.mubr.f32.mxu0 %v657_v30  ;;  %307 = vmatprep.mubr.f32.mxu1 %v750_v38 }
  0xbe   :  { %212 = vmatmul.mubr.f32.gmra.mrb[20].mxu0 %v665_v34  ;;  %308 = vmatmul.mubr.f32.gmra.mrb[20].mxu1 %v758_v49 }
  0xbf   :  { %217 = vmatprep.mubr.f32.mxu0 %v659_v31  ;;  %313 = vmatprep.mubr.f32.mxu1 %v752_v39 }
  0xc2   :  { %218 = vmatmul.mubr.f32.gmra.mrb[22].mxu0 %v667_v35  ;;  %314 = vmatmul.mubr.f32.gmra.mrb[22].mxu1 %v760_v50 }
  0xc3   :  { %223 = vmatprep.mubr.f32.mxu0 %v669_v36  ;;  %319 = vmatprep.mubr.f32.mxu1 %v762_v55 }
  0xc6   :  { %224 = vmatmul.mubr.f32.gmra.mrb[24].mxu0 %v677_v40  ;;  %320 = vmatmul.mubr.f32.gmra.mrb[24].mxu1 %v770_v8 }
  0xc7   :  { %229 = vmatprep.mubr.f32.mxu0 %v671_v37  ;;  %325 = vmatprep.mubr.f32.mxu1 %v764_v56 }
  0xca   :  { %230 = vmatmul.mubr.f32.gmra.mrb[26].mxu0 %v679_v41  ;;  %326 = vmatmul.mubr.f32.gmra.mrb[26].mxu1 %v772_v13 }
  0xcb   :  { %235 = vmatprep.mubr.f32.mxu0 %v681_v42  ;;  %331 = vmatprep.mubr.f32.mxu1 %v774_v26 }
  0xce   :  { %236 = vmatmul.mubr.f32.gmra.mrb[28].mxu0 %v689_v46  ;;  %332 = vmatmul.mubr.f32.gmra.mrb[28].mxu1 %v83_v61 }
  0xcf   :  { %241 = vmatprep.mubr.f32.mxu0 %v683_v43  ;;  %337 = vmatprep.mubr.f32.mxu1 %v776_v27 }
  0xd2   :  { %242 = vmatmul.mubr.f32.gmra.mrb[30].mxu0 %v865_v1  ;;  %338 = vmatmul.mubr.f32.gmra.mrb[30].mxu1 %v782_v62 }
 0x169   :  { %v153_v2 = vpop.f32.mrb[0].mxu0  ;;  %v249_v4 = vpop.f32.mrb[0].mxu1 }
 0x16a   :  { %344 = vst [vmem:[#allocation5] sm:$0xff] %v153_v2  ;;  %376 = vst [vmem:[#allocation5 + $0x100] sm:$0xff] %v249_v4  ;;  %v155_v5 = vpop.f32.mrb[1].mxu0  ;;  %v251_v6 = vpop.f32.mrb[1].mxu1 }
 0x16b   :  { %345 = vst [vmem:[#allocation5 + $0x8] sm:$0xff] %v155_v5  ;;  %377 = vst [vmem:[#allocation5 + $0x108] sm:$0xff] %v251_v6 }
 0x16d   :  { %v159_v9 = vpop.f32.mrb[2].mxu0  ;;  %v255_v10 = vpop.f32.mrb[2].mxu1 }
 0x16e   :  { %346 = vst [vmem:[#allocation5 + $0x10] sm:$0xff] %v159_v9  ;;  %378 = vst [vmem:[#allocation5 + $0x110] sm:$0xff] %v255_v10  ;;  %v161_v11 = vpop.f32.mrb[3].mxu0  ;;  %v257_v12 = vpop.f32.mrb[3].mxu1 }
 0x16f   :  { %347 = vst [vmem:[#allocation5 + $0x18] sm:$0xff] %v161_v11  ;;  %379 = vst [vmem:[#allocation5 + $0x118] sm:$0xff] %v257_v12 }
 0x171   :  { %v165_v16 = vpop.f32.mrb[4].mxu0  ;;  %v261_v17 = vpop.f32.mrb[4].mxu1 }
 0x172   :  { %348 = vst [vmem:[#allocation5 + $0x20] sm:$0xff] %v165_v16  ;;  %380 = vst [vmem:[#allocation5 + $0x120] sm:$0xff] %v261_v17  ;;  %v167_v18 = vpop.f32.mrb[5].mxu0  ;;  %v263_v19 = vpop.f32.mrb[5].mxu1 }
 0x173   :  { %349 = vst [vmem:[#allocation5 + $0x28] sm:$0xff] %v167_v18  ;;  %381 = vst [vmem:[#allocation5 + $0x128] sm:$0xff] %v263_v19 }
 0x175   :  { %v171_v22 = vpop.f32.mrb[6].mxu0  ;;  %v267_v23 = vpop.f32.mrb[6].mxu1 }
 0x176   :  { %350 = vst [vmem:[#allocation5 + $0x30] sm:$0xff] %v171_v22  ;;  %382 = vst [vmem:[#allocation5 + $0x130] sm:$0xff] %v267_v23  ;;  %v173_v24 = vpop.f32.mrb[7].mxu0  ;;  %v269_v25 = vpop.f32.mrb[7].mxu1 }
 0x177   :  { %351 = vst [vmem:[#allocation5 + $0x38] sm:$0xff] %v173_v24  ;;  %383 = vst [vmem:[#allocation5 + $0x138] sm:$0xff] %v269_v25 }
 0x179   :  { %v177_v28 = vpop.f32.mrb[8].mxu0  ;;  %v273_v29 = vpop.f32.mrb[8].mxu1 }
 0x17a   :  { %352 = vst [vmem:[#allocation5 + $0x40] sm:$0xff] %v177_v28  ;;  %384 = vst [vmem:[#allocation5 + $0x140] sm:$0xff] %v273_v29  ;;  %v179_v30 = vpop.f32.mrb[9].mxu0  ;;  %v275_v31 = vpop.f32.mrb[9].mxu1 }
 0x17b   :  { %353 = vst [vmem:[#allocation5 + $0x48] sm:$0xff] %v179_v30  ;;  %385 = vst [vmem:[#allocation5 + $0x148] sm:$0xff] %v275_v31 }
 0x17d   :  { %v183_v34 = vpop.f32.mrb[10].mxu0  ;;  %v279_v35 = vpop.f32.mrb[10].mxu1 }
 0x17e   :  { %354 = vst [vmem:[#allocation5 + $0x50] sm:$0xff] %v183_v34  ;;  %386 = vst [vmem:[#allocation5 + $0x150] sm:$0xff] %v279_v35  ;;  %v185_v36 = vpop.f32.mrb[11].mxu0  ;;  %v281_v37 = vpop.f32.mrb[11].mxu1 }
 0x17f   :  { %355 = vst [vmem:[#allocation5 + $0x58] sm:$0xff] %v185_v36  ;;  %387 = vst [vmem:[#allocation5 + $0x158] sm:$0xff] %v281_v37 }
 0x181   :  { %v189_v40 = vpop.f32.mrb[12].mxu0  ;;  %v285_v41 = vpop.f32.mrb[12].mxu1 }
 0x182   :  { %356 = vst [vmem:[#allocation5 + $0x60] sm:$0xff] %v189_v40  ;;  %388 = vst [vmem:[#allocation5 + $0x160] sm:$0xff] %v285_v41  ;;  %v191_v42 = vpop.f32.mrb[13].mxu0  ;;  %v287_v43 = vpop.f32.mrb[13].mxu1 }
 0x183   :  { %357 = vst [vmem:[#allocation5 + $0x68] sm:$0xff] %v191_v42  ;;  %389 = vst [vmem:[#allocation5 + $0x168] sm:$0xff] %v287_v43 }
 0x185   :  { %v195_v46 = vpop.f32.mrb[14].mxu0  ;;  %v291_v47 = vpop.f32.mrb[14].mxu1 }
 0x186   :  { %358 = vst [vmem:[#allocation5 + $0x70] sm:$0xff] %v195_v46  ;;  %390 = vst [vmem:[#allocation5 + $0x170] sm:$0xff] %v291_v47  ;;  %v197_v48 = vpop.f32.mrb[15].mxu0  ;;  %v293_v51 = vpop.f32.mrb[15].mxu1 }
 0x187   :  { %359 = vst [vmem:[#allocation5 + $0x78] sm:$0xff] %v197_v48  ;;  %391 = vst [vmem:[#allocation5 + $0x178] sm:$0xff] %v293_v51 }
 0x189   :  { %v201_v52 = vpop.f32.mrb[16].mxu0  ;;  %v297_v53 = vpop.f32.mrb[16].mxu1 }
 0x18a   :  { %360 = vst [vmem:[#allocation5 + $0x80] sm:$0xff] %v201_v52  ;;  %392 = vst [vmem:[#allocation5 + $0x180] sm:$0xff] %v297_v53  ;;  %v203_v54 = vpop.f32.mrb[17].mxu0  ;;  %v299_v57 = vpop.f32.mrb[17].mxu1 }
 0x18b   :  { %361 = vst [vmem:[#allocation5 + $0x88] sm:$0xff] %v203_v54  ;;  %393 = vst [vmem:[#allocation5 + $0x188] sm:$0xff] %v299_v57 }
 0x18d   :  { %v207_v58 = vpop.f32.mrb[18].mxu0  ;;  %v303_v59 = vpop.f32.mrb[18].mxu1 }
 0x18e   :  { %362 = vst [vmem:[#allocation5 + $0x90] sm:$0xff] %v207_v58  ;;  %394 = vst [vmem:[#allocation5 + $0x190] sm:$0xff] %v303_v59  ;;  %v209_v60 = vpop.f32.mrb[19].mxu0  ;;  %v305_v63 = vpop.f32.mrb[19].mxu1 }
 0x18f   :  { %363 = vst [vmem:[#allocation5 + $0x98] sm:$0xff] %v209_v60  ;;  %395 = vst [vmem:[#allocation5 + $0x198] sm:$0xff] %v305_v63 }
 0x191   :  { %v213_v0 = vpop.f32.mrb[20].mxu0  ;;  %v309_v3 = vpop.f32.mrb[20].mxu1 }
 0x192   :  { %364 = vst [vmem:[#allocation5 + $0xa0] sm:$0xff] %v213_v0  ;;  %396 = vst [vmem:[#allocation5 + $0x1a0] sm:$0xff] %v309_v3  ;;  %v215_v7 = vpop.f32.mrb[21].mxu0  ;;  %v311_v14 = vpop.f32.mrb[21].mxu1 }
 0x193   :  { %365 = vst [vmem:[#allocation5 + $0xa8] sm:$0xff] %v215_v7  ;;  %397 = vst [vmem:[#allocation5 + $0x1a8] sm:$0xff] %v311_v14 }
 0x195   :  { %v219_v15 = vpop.f32.mrb[22].mxu0  ;;  %v315_v20 = vpop.f32.mrb[22].mxu1 }
 0x196   :  { %366 = vst [vmem:[#allocation5 + $0xb0] sm:$0xff] %v219_v15  ;;  %398 = vst [vmem:[#allocation5 + $0x1b0] sm:$0xff] %v315_v20  ;;  %v221_v21 = vpop.f32.mrb[23].mxu0  ;;  %v317_v32 = vpop.f32.mrb[23].mxu1 }
 0x197   :  { %367 = vst [vmem:[#allocation5 + $0xb8] sm:$0xff] %v221_v21  ;;  %399 = vst [vmem:[#allocation5 + $0x1b8] sm:$0xff] %v317_v32 }
 0x199   :  { %v225_v33 = vpop.f32.mrb[24].mxu0  ;;  %v321_v38 = vpop.f32.mrb[24].mxu1 }
 0x19a   :  { %368 = vst [vmem:[#allocation5 + $0xc0] sm:$0xff] %v225_v33  ;;  %400 = vst [vmem:[#allocation5 + $0x1c0] sm:$0xff] %v321_v38  ;;  %v227_v39 = vpop.f32.mrb[25].mxu0  ;;  %v323_v49 = vpop.f32.mrb[25].mxu1 }
 0x19b   :  { %369 = vst [vmem:[#allocation5 + $0xc8] sm:$0xff] %v227_v39  ;;  %401 = vst [vmem:[#allocation5 + $0x1c8] sm:$0xff] %v323_v49 }
 0x19d   :  { %v231_v50 = vpop.f32.mrb[26].mxu0  ;;  %v327_v55 = vpop.f32.mrb[26].mxu1 }
 0x19e   :  { %370 = vst [vmem:[#allocation5 + $0xd0] sm:$0xff] %v231_v50  ;;  %402 = vst [vmem:[#allocation5 + $0x1d0] sm:$0xff] %v327_v55  ;;  %v233_v56 = vpop.f32.mrb[27].mxu0  ;;  %v329_v8 = vpop.f32.mrb[27].mxu1 }
 0x19f   :  { %371 = vst [vmem:[#allocation5 + $0xd8] sm:$0xff] %v233_v56  ;;  %403 = vst [vmem:[#allocation5 + $0x1d8] sm:$0xff] %v329_v8 }
 0x1a1   :  { %v237_v13 = vpop.f32.mrb[28].mxu0  ;;  %v333_v26 = vpop.f32.mrb[28].mxu1 }
 0x1a2   :  { %372 = vst [vmem:[#allocation5 + $0xe0] sm:$0xff] %v237_v13  ;;  %404 = vst [vmem:[#allocation5 + $0x1e0] sm:$0xff] %v333_v26  ;;  %v239_v27 = vpop.f32.mrb[29].mxu0  ;;  %v335_v44 = vpop.f32.mrb[29].mxu1 }
 0x1a3   :  { %373 = vst [vmem:[#allocation5 + $0xe8] sm:$0xff] %v239_v27  ;;  %405 = vst [vmem:[#allocation5 + $0x1e8] sm:$0xff] %v335_v44 }
 0x1a5   :  { %v243_v45 = vpop.f32.mrb[30].mxu0  ;;  %v339_v61 = vpop.f32.mrb[30].mxu1 }
 0x1a6   :  { %374 = vst [vmem:[#allocation5 + $0xf0] sm:$0xff] %v243_v45  ;;  %406 = vst [vmem:[#allocation5 + $0x1f0] sm:$0xff] %v339_v61  ;;  %v245_v62 = vpop.f32.mrb[31].mxu0  ;;  %v341_v1 = vpop.f32.mrb[31].mxu1 }
 0x1a7   :  { %375 = vst [vmem:[#allocation5 + $0xf8] sm:$0xff] %v245_v62  ;;  %407 = vst [vmem:[#allocation5 + $0x1f8] sm:$0xff] %v341_v1 }
 0x1a8   :  { %558 = shalt.err (!%p555_p12)
}
 0x1a9   :  { %s559_s24 = scalar_lea.hbm %s862_s1, 8192 }
 0x1aa   :  { %p560_p13 = scmp.ne.s32.totalorder %s862_s1, %s559_s24  ;;  %p563_p0 = scmp.lt.u32.totalorder %s559_s24, %s862_s1 }
 0x1ac   :  { %p565_p1 = pnand %p563_p0, %p560_p13 }
 0x1ae   :  { %568 = shalt.err (!%p565_p1)
}
 0x1af   :  { %419 = dma.vmem_to_hbm [thread:$0]  %s414_s20, 8192, %s862_s1, [#allocation4], %s574_s16, %s574_s16, %s575_s17  }
 0x1b0   :  { %571 = dma.done.wait [#allocation4], 8192  }
 0x1b1   :  { %572 = vsyncadd [#allocation4], 4294959104 }
 0x1b2   :  { %423 = vsyncpa [#allocation3], 1 }
 0x1b3   :  { %424 = vsyncpa [#allocation4], 1 }

</bundles_post_ra>
